<compile_context>
chip_gen: v7x
topology: tpu7x:2x2x1
jax: 0.10.0
libtpu: 0.0.40
codegen_flags: <defaults>
</compile_context>

<pallas_src>
from functools import partial

import jax
import jax.numpy as jnp
from jax.experimental import pallas as pl
from jax.experimental.pallas import tpu as pltpu


def _cdiv(a, b):
    return -(-a // b)


def _round_up(a, m):
    return _cdiv(a, m) * m


# ---------------------------------------------------------------------------
# Pallas kernel: fused (pool + conv) matmul + bias + ReLU
# ---------------------------------------------------------------------------
def netpool2d_kernel(x_ref, w_ref, b_ref, out_ref):
    # x_ref: (BT, 512)  w_ref: (512, 32)  b_ref: (1, 32) f32  out_ref: (BT, 32) f32
    # f32 path keeps HIGHEST accuracy (extra MXU passes are hidden under the
    # HBM bound); bf16 streaming path uses DEFAULT with an f32 accumulator.
    prec = (jax.lax.Precision.HIGHEST if x_ref.dtype == jnp.float32
            else jax.lax.Precision.DEFAULT)
    y = jnp.dot(x_ref[...], w_ref[...],
                preferred_element_type=jnp.float32, precision=prec)
    out_ref[...] = jnp.maximum(y + b_ref[...], 0.0)


# ---------------------------------------------------------------------------
# Fold AvgPool(2,2) -> AvgPool(1,2) -> Conv2d(2,4,k=2,s=2) into one (512, 32)
# dense matrix (the 1/8 average is folded into the weights).
# ---------------------------------------------------------------------------
def _build_fused_weight(w):
    """w: (Cout=4, C=2, Kh=2, Kw=2) -> M: (512, 32).

    Input flat index  i = c*256 + (4*ho + 2*kh + r)*16 + (8*wo + 4*kw + s)
                        = c*256 + ho*64 + kh*32 + r*16 + wo*8 + kw*4 + s
    Output flat index j = cout*8 + ho*2 + wo            (NCHW (B,4,4,2) flatten)
    M[i, j] = w[cout, c, kh, kw] / 8 * [ho_i == ho_j] * [wo_i == wo_j]
    """
    Cout, C, Kh, Kw = w.shape
    Ho, Wo, R, S = 4, 2, 2, 4
    w_scaled = (w / 8.0).astype(jnp.float32)                 # fold the 2x4 average
    w_t = jnp.transpose(w_scaled, (1, 2, 3, 0))              # (c, kh, kw, cout)
    eye_ho = jnp.eye(Ho, dtype=jnp.float32)
    eye_wo = jnp.eye(Wo, dtype=jnp.float32)
    # target dims: (c, ho_i, kh, r, wo_i, kw, s, cout, ho_j, wo_j)
    m = (w_t[:, None, :, None, None, :, None, :, None, None]
         * eye_ho[None, :, None, None, None, None, None, None, :, None]
         * eye_wo[None, None, None, None, :, None, None, None, None, :])
    m = jnp.broadcast_to(m, (C, Ho, Kh, R, Wo, Kw, S, Cout, Ho, Wo))
    return m.reshape(C * 16 * 16, Cout * Ho * Wo)            # (512, 32)


# ---------------------------------------------------------------------------
# Wrapper: batch tiling + pallas_call
# ---------------------------------------------------------------------------
@partial(jax.jit, static_argnames=("block_b", "use_bf16"))
def netpool2d_forward(x, w, b, *, block_b=4096, use_bf16=False):
    """x: (B, 2, 16, 16) NCHW; w: (4, 2, 2, 2); b: (4,). Returns (B, 4, 4, 2) f32."""
    B, C, H, W = x.shape
    assert (C, H, W) == (2, 16, 16)
    Cout, Ho, Wo = 4, 4, 2
    Kin = C * H * W          # 512
    Nout = Cout * Ho * Wo    # 32

    # Sublane granularity: 8 for f32, 16 for bf16 packing.  Robustness: force
    # block_b itself onto that granularity regardless of what the caller passed.
    sub = 16 if use_bf16 else 8
    block_b = max(sub, (block_b // sub) * sub)

    # >= 2 grid steps, even count (>= 1 step per v7x TensorCore), tile derived
    # from B so padding stays at a few rows instead of up to block_b - 1.
    steps = _round_up(max(2, _cdiv(B, block_b)), 2)
    BT = min(block_b, _round_up(_cdiv(B, steps), sub))
    B_pad = steps * BT

    lhs_dtype = jnp.bfloat16 if use_bf16 else jnp.float32
    x_flat = x.reshape(B, Kin).astype(lhs_dtype)      # free reshape (contiguous NCHW)
    if B_pad != B:
        # Only a handful of padded rows by construction (< steps * sub).
        x_flat = jnp.pad(x_flat, ((0, B_pad - B), (0, 0)))

    w_mat = _build_fused_weight(w).astype(lhs_dtype)                      # (512, 32)
    b_vec = jnp.broadcast_to(b.astype(jnp.float32)[:, None, None],
                             (Cout, Ho, Wo)).reshape(1, Nout)             # (1, 32)

    lhs_bytes = jnp.dtype(lhs_dtype).itemsize
    cost = pl.CostEstimate(
        flops=2 * B_pad * Kin * Nout,
        transcendentals=0,
        bytes_accessed=(B_pad * Kin * lhs_bytes          # stream x
                        + Kin * Nout * lhs_bytes         # fused weight
                        + B_pad * Nout * 4),             # output
    )

    out = pl.pallas_call(
        netpool2d_kernel,
        out_shape=jax.ShapeDtypeStruct((B_pad, Nout), jnp.float32),
        grid_spec=pltpu.PrefetchScalarGridSpec(
            num_scalar_prefetch=0,
            grid=(steps,),
            in_specs=[
                pl.BlockSpec((BT, Kin), lambda i: (i, 0)),
                pl.BlockSpec((Kin, Nout), lambda i: (0, 0)),
                pl.BlockSpec((1, Nout), lambda i: (0, 0)),
            ],
            out_specs=pl.BlockSpec((BT, Nout), lambda i: (i, 0)),
        ),
        compiler_params=pltpu.CompilerParams(
            dimension_semantics=("parallel",),
            vmem_limit_bytes=32 * 1024 * 1024,   # load-bearing on v5e; safe on v7x
        ),
        cost_estimate=cost,
    )(x_flat, w_mat, b_vec)

    # (B_pad, 32) -> (B, Cout, Ho, Wo); the 32-wide flatten is already NCHW order.
    return out[:B].reshape(B, Cout, Ho, Wo)


# ---------------------------------------------------------------------------
# Pure-JAX reference
# ---------------------------------------------------------------------------
def reference_forward(x, w, b):
    B = x.shape[0]
    # AvgPool2d((2,2)) then AvgPool2d((1,2)) == mean over 2x4 blocks
    pooled = x.reshape(B, 2, 8, 2, 4, 4).mean(axis=(3, 5))              # (B, 2, 8, 4)
    # Conv2d(2, 4, k=2, s=2)
    pr = pooled.reshape(B, 2, 4, 2, 2, 2)                               # (B, c, ho, kh, wo, kw)
    patches = jnp.transpose(pr, (0, 2, 4, 1, 3, 5)).reshape(B, 8, 8)
    y = jnp.einsum("bpk,ok->bpo", patches, w.reshape(4, 8),
                   precision=jax.lax.Precision.HIGHEST) + b[None, None, :]
    y = jnp.maximum(y, 0.0)
    return jnp.transpose(y.reshape(B, 4, 2, 4), (0, 3, 1, 2))


if __name__ == "__main__":
    key = jax.random.PRNGKey(0)
    kx, kw, kb, kx2 = jax.random.split(key, 4)

    # PyTorch-style conv init: uniform(-1/sqrt(fan_in), 1/sqrt(fan_in)), fan_in=8
    bound = 1.0 / jnp.sqrt(8.0)
    w = jax.random.uniform(kw, (4, 2, 2, 2), minval=-bound, maxval=bound, dtype=jnp.float32)
    b = jax.random.uniform(kb, (4,), minval=-bound, maxval=bound, dtype=jnp.float32)

    # Case 1: small batch, f32 path.
    B = 2
    x = jax.random.normal(kx, (B, 2, 16, 16), dtype=jnp.float32)
    out = jax.block_until_ready(netpool2d_forward(x, w, b))
    ref = jax.block_until_ready(reference_forward(x, w, b))
    assert out.shape == (B, 4, 4, 2), out.shape
    assert jnp.allclose(out, ref, atol=1e-5, rtol=1e-5), "f32 mismatch (B=2)"

    # Case 2: batch not aligned to the tile (exercises the tiny-pad path).
    B2 = 13
    x2 = jax.random.normal(kx2, (B2, 2, 16, 16), dtype=jnp.float32)
    out2 = jax.block_until_ready(netpool2d_forward(x2, w, b))
    ref2 = jax.block_until_ready(reference_forward(x2, w, b))
    assert out2.shape == (B2, 4, 4, 2), out2.shape
    assert jnp.allclose(out2, ref2, atol=1e-5, rtol=1e-5), "f32 mismatch (B=13)"

    # Case 3: bf16-streaming path (bandwidth optimization), loose tolerance.
    out_bf16 = jax.block_until_ready(netpool2d_forward(x, w, b, use_bf16=True))
    assert out_bf16.shape == (B, 4, 4, 2), out_bf16.shape
    assert jnp.allclose(out_bf16, ref, atol=2e-2, rtol=2e-2), "bf16 mismatch"

    print("KERNEL_OK")
</pallas_src>

<mosaic_0001>
module attributes {stable_mosaic.version = 11 : i64} {
  func.func @netpool2d_kernel(%arg0: i32, %arg1: memref<8x512xf32, #tpu.memory_space<vmem>>, %arg2: memref<512x32xf32, #tpu.memory_space<vmem>>, %arg3: memref<1x32xf32, #tpu.memory_space<vmem>>, %arg4: memref<8x32xf32, #tpu.memory_space<vmem>>) attributes {dimension_semantics = [#tpu.dimension_semantics<parallel>], iteration_bounds = array<i64: 2>, scalar_prefetch = 0 : i64, scratch_operands = 0 : i64, tpu.core_type = #tpu.core_type<tc>, window_params = [{transform_indices = @transform_0, window_bounds = array<i64: 8, 512>}, {pipeline_mode = #tpu.pipeline_mode<synchronous>, transform_indices = @transform_1, window_bounds = array<i64: 512, 32>}, {pipeline_mode = #tpu.pipeline_mode<synchronous>, transform_indices = @transform_2, window_bounds = array<i64: 1, 32>}, {transform_indices = @transform_3, window_bounds = array<i64: 8, 32>}]} {
    %c0 = arith.constant 0 : index
    %c0_0 = arith.constant 0 : index
    %0 = vector.load %arg1[%c0, %c0_0] : memref<8x512xf32, #tpu.memory_space<vmem>>, vector<8x512xf32>
    %c0_1 = arith.constant 0 : index
    %c0_2 = arith.constant 0 : index
    %1 = vector.load %arg2[%c0_1, %c0_2] : memref<512x32xf32, #tpu.memory_space<vmem>>, vector<512x32xf32>
    %cst = arith.constant dense<0.000000e+00> : vector<8x32xf32>
    %2 = tpu.matmul %0, %1, %cst {dimension_numbers = #tpu.dot_dimension_numbers<[1], [0], [0], [1], [0, 0, 1, 1], [], []>, precision = #tpu.contract_precision<fp32>} : vector<8x512xf32>, vector<512x32xf32>, vector<8x32xf32> -> vector<8x32xf32>
    %c0_3 = arith.constant 0 : index
    %c0_4 = arith.constant 0 : index
    %3 = vector.load %arg3[%c0_3, %c0_4] : memref<1x32xf32, #tpu.memory_space<vmem>>, vector<1x32xf32>
    %4 = vector.broadcast %3 : vector<1x32xf32> to vector<8x32xf32>
    %5 = arith.addf %2, %4 : vector<8x32xf32>
    %cst_5 = arith.constant 0.000000e+00 : f32
    %6 = vector.broadcast %cst_5 : f32 to vector<8x32xf32>
    %7 = arith.maximumf %5, %6 : vector<8x32xf32>
    %c0_6 = arith.constant 0 : index
    %c0_7 = arith.constant 0 : index
    %8 = vector.load %arg4[%c0_6, %c0_7] : memref<8x32xf32, #tpu.memory_space<vmem>>, vector<8x32xf32>
    tpu.vector_store %arg4[%c0_6, %c0_7], %7 {strides = array<i32>} : memref<8x32xf32, #tpu.memory_space<vmem>>, vector<8x32xf32>,
    return
  }
  func.func @transform_0(%arg0: i32) -> (i32, i32) {
    %c0_i32 = arith.constant 0 : i32
    %c0_i32_0 = arith.constant 0 : i32
    return %arg0, %c0_i32 : i32, i32
  }
  func.func @transform_1(%arg0: i32) -> (i32, i32) {
    %c0_i32 = arith.constant 0 : i32
    %c0_i32_0 = arith.constant 0 : i32
    %c0_i32_1 = arith.constant 0 : i32
    return %c0_i32, %c0_i32_0 : i32, i32
  }
  func.func @transform_2(%arg0: i32) -> (i32, i32) {
    %c0_i32 = arith.constant 0 : i32
    %c0_i32_0 = arith.constant 0 : i32
    %c0_i32_1 = arith.constant 0 : i32
    return %c0_i32, %c0_i32_0 : i32, i32
  }
  func.func @transform_3(%arg0: i32) -> (i32, i32) {
    %c0_i32 = arith.constant 0 : i32
    %c0_i32_0 = arith.constant 0 : i32
    return %arg0, %c0_i32 : i32, i32
  }
}

</mosaic_0001>

<bundles_post_ra>
// kernel: netpool2d_forward.1
= control target key start
LH: loop header
LB: loop body
LE: loop exit
PB: predicated region body
PF: predicated region fallthrough
CT: control target
= control target key end

     0   :  { %s2876_s12 = smov 0   ;;  %s3977_s0 = inlined_call_operand.vmem [shape: f32[16,512], index: 0, kind: input, shape index: {}]   ;;  %s3978_s1 = inlined_call_operand.vmem [shape: f32[512,32], index: 1, kind: input, shape index: {}]   ;;  %s3979_s2 = inlined_call_operand.vmem [shape: f32[1,32], index: 2, kind: input, shape index: {}]   ;;  %s3980_s3 = inlined_call_operand.vmem [shape: f32[16,32], index: 3, kind: output, shape index: {}]  }
   0x1 LB: > { %s2024_s13 = sadd.s32 4294967295, %s2854_s12   ;;  %p2028_p0 = scmp.ge.s32.totalorder %s2854_s12, 1  ;;  %s2854_s12 = sphi %s2876_s12, %s13_s12  }
   0x2   : > { %p137_p1 = scmp.lt.s32.totalorder %s2854_s12, 3 }
   0x4   : > { %p138_p2 = pnand %p2028_p0, %p137_p1 }
   0x6   : > { %141 = sbr.rel (%p138_p2) target bundleno = 454 (0x1c6), region = 32 }
   0xd   : > { %v189_v0 = vld [vmem:[%s3978_s1 + $0x80] sm:$0xff]  ;;  %v190_v1 = vld [vmem:[%s3978_s1 + $0x88] sm:$0xff]  ;;  %v191_v7 = vld [vmem:[%s3978_s1 + $0x90] sm:$0xff]  ;;  %p3076_p3 = scmp.lt.s32.totalorder %s2024_s13, 1  ;;  %vm1969_vm0 = vcmask 261120  }
   0xe   : > { %v173_v2 = vld [vmem:[%s3978_s1] sm:$0xff]  ;;  %v293_v3 = vand.u32 4294901760, %v189_v0  ;;  %v296_v4 = vand.u32 4294901760, %v190_v1  ;;  %v174_v5 = vld [vmem:[%s3978_s1 + $0x8] sm:$0xff]  ;;  %v192_v8 = vld [vmem:[%s3978_s1 + $0x98] sm:$0xff]  ;;  %v299_v10 = vand.u32 4294901760, %v191_v7 }
   0xf   : > { %v245_v6 = vand.u32 4294901760, %v173_v2  ;;  %v248_v9 = vand.u32 4294901760, %v174_v5  ;;  %v302_v11 = vand.u32 4294901760, %v192_v8  ;;  %v175_v12 = vld [vmem:[%s3978_s1 + $0x10] sm:$0xff]  ;;  %v176_v13 = vld [vmem:[%s3978_s1 + $0x18] sm:$0xff]  ;;  %v193_v18 = vld [vmem:[%s3978_s1 + $0xa0] sm:$0xff] }
  0x10   : > { %v2908_v14 = vpack.c.bf16 %v296_v4, %v293_v3  ;;  %v251_v16 = vand.u32 4294901760, %v175_v12  ;;  %v254_v17 = vand.u32 4294901760, %v176_v13  ;;  %v194_v19 = vld [vmem:[%s3978_s1 + $0xa8] sm:$0xff]  ;;  %v177_v23 = vld [vmem:[%s3978_s1 + $0x20] sm:$0xff]  ;;  %v2931_v25 = vsub.f32 %v191_v7, %v299_v10  ;;  %v195_v37 = vld [vmem:[%s3978_s1 + $0xb0] sm:$0xff]  ;;  %s4187_s13 = smov (!%p3076_p3, %s2024_s13), 1 }
  0x11   : > { %v2910_v15 = vsub.f32 %v173_v2, %v245_v6  ;;  %v2918_v20 = vpack.c.bf16 %v248_v9, %v245_v6  ;;  %v2920_v21 = vsub.f32 %v174_v5, %v248_v9  ;;  %v2922_v22 = vpack.c.bf16 %v302_v11, %v299_v10  ;;  %v178_v24 = vld [vmem:[%s3978_s1 + $0x28] sm:$0xff]  ;;  %v196_v42 = vld [vmem:[%s3978_s1 + $0xb8] sm:$0xff]  ;;  %v179_v55 = vld [vmem:[%s3978_s1 + $0x30] sm:$0xff]  ;;  %s2035_s25 = sshll.u32 %s4187_s13, 5 }
  0x12   : > { %2457 = vmatprep.subr.bf16.mxu0 %v2908_v14  ;;  %v2933_v26 = vsub.f32 %v192_v8, %v302_v11  ;;  %v2935_v27 = vpack.c.bf16 %v254_v17, %v251_v16  ;;  %v2937_v28 = vsub.f32 %v175_v12, %v251_v16  ;;  %v305_v29 = vand.u32 4294901760, %v193_v18  ;;  %v180_v56 = vld [vmem:[%s3978_s1 + $0x38] sm:$0xff]  ;;  %v197_v5 = vld [vmem:[%s3978_s1 + $0xc0] sm:$0xff]  ;;  %v198_v6 = vld [vmem:[%s3978_s1 + $0xc8] sm:$0xff]  ;;  %s3171_s5 = scalar_lea.vmem %s3977_s0, %s2035_s25  ;;  %s2031_s25 = sshll.u32 %s4187_s13, 3 }
  0x13   : > { %2459 = vmatpush3.bf16.msra.mxu0 %v2918_v20  ;;  %v308_v30 = vand.u32 4294901760, %v194_v19  ;;  %v2940_v31 = vsub.f32 %v189_v0, %v293_v3  ;;  %v2942_v32 = vsub.f32 %v190_v1, %v296_v4  ;;  %v257_v33 = vand.u32 4294901760, %v177_v23  ;;  %v181_v11 = vld [vmem:[%s3978_s1 + $0x40] sm:$0xff]  ;;  %s168_s28 = scalar_lea.vmem %s3980_s3, %s2031_s25 }
  0x14   : > { %2461 = vmatprep.subr.bf16.mxu0 %v2922_v22  ;;  %v260_v34 = vand.u32 4294901760, %v178_v24  ;;  %v3998_v35 = vand.u32 4294901760, %v2910_v15  ;;  %v3997_v36 = vand.u32 4294901760, %v2920_v21  ;;  %v2950_v38 = vsub.f32 %v176_v13, %v254_v17 }
  0x15   : > { %v2952_v39 = vpack.c.bf16 %v308_v30, %v305_v29  ;;  %v2954_v40 = vsub.f32 %v193_v18, %v305_v29  ;;  %v4000_v41 = vand.u32 4294901760, %v2940_v31  ;;  %v2960_v43 = vsub.f32 %v194_v19, %v308_v30  ;;  %v182_v29 = vld [vmem:[%s3978_s1 + $0x48] sm:$0xff] }
  0x16   : > { %v3999_v44 = vand.u32 4294901760, %v2942_v32  ;;  %v2963_v45 = vpack.c.bf16 %v260_v34, %v257_v33  ;;  %v2965_v46 = vsub.f32 %v177_v23, %v257_v33  ;;  %v360_v48 = vsub.f32 %v2910_v15, %v3998_v35 }
  0x17   : > { %2463 = vmatpush3.bf16.msra.mxu0 %v2935_v27  ;;  %v472_v47 = vsub.f32 %v2940_v31, %v4000_v41  ;;  %v367_v49 = vsub.f32 %v2920_v21, %v3997_v36  ;;  %v311_v50 = vand.u32 4294901760, %v195_v37  ;;  %v314_v52 = vand.u32 4294901760, %v196_v42  ;;  %v170_v41 = vld [vmem:[%s3171_s5 + $0x8] sm:$0xff] }
  0x18   : > { %2465 = vmatprep.subr.bf16.mxu0 %v2952_v39  ;;  %v479_v51 = vsub.f32 %v2942_v32, %v3999_v44  ;;  %v3996_v53 = vand.u32 4294901760, %v2931_v25  ;;  %v3993_v54 = vand.u32 4294901760, %v2933_v26  ;;  %v2989_v58 = vsub.f32 %v178_v24, %v260_v34 }
  0x19   : > { %v473_v57 = vand.u32 4294901760, %v472_v47  ;;  %v361_v59 = vand.u32 4294901760, %v360_v48  ;;  %v368_v60 = vand.u32 4294901760, %v367_v49  ;;  %v2991_v62 = vpack.c.bf16 %v314_v52, %v311_v50 }
  0x1a   : > { %v480_v61 = vand.u32 4294901760, %v479_v51  ;;  %v2993_v63 = vsub.f32 %v195_v37, %v311_v50  ;;  %v486_v0 = vsub.f32 %v2931_v25, %v3996_v53  ;;  %v493_v2 = vsub.f32 %v2933_v26, %v3993_v54 }
  0x1b   : > { %2467 = vmatpush3.bf16.msra.mxu0 %v2963_v45  ;;  %v2490_v1 = vpack.c.bf16 %v368_v60, %v361_v59  ;;  %v263_v3 = vand.u32 4294901760, %v179_v55  ;;  %v266_v4 = vand.u32 4294901760, %v180_v56  ;;  %v3992_v9 = vand.u32 4294901760, %v2937_v28 }
  0x1c   : > { %v2488_v7 = vpack.c.bf16 %v480_v61, %v473_v57  ;;  %2469 = vmatprep.subr.bf16.mxu0 %v2991_v62  ;;  %v487_v8 = vand.u32 4294901760, %v486_v0  ;;  %v3989_v10 = vand.u32 4294901760, %v2950_v38  ;;  %v3014_v12 = vsub.f32 %v196_v42, %v314_v52  ;;  %v200_v57 = vld [vmem:[%s3978_s1 + $0xd8] sm:$0xff] }
  0x1d   : > { %v494_v13 = vand.u32 4294901760, %v493_v2  ;;  %v3016_v16 = vpack.c.bf16 %v266_v4, %v263_v3  ;;  %v3018_v17 = vsub.f32 %v179_v55, %v263_v3  ;;  %v374_v18 = vsub.f32 %v2937_v28, %v3992_v9 }
  0x1e   : > { %2489 = vmatprep.subr.bf16.mxu1 %v2488_v7  ;;  %v381_v19 = vsub.f32 %v2950_v38, %v3989_v10  ;;  %v317_v23 = vand.u32 4294901760, %v197_v5  ;;  %v320_v24 = vand.u32 4294901760, %v198_v6  ;;  %v3988_v33 = vand.u32 4294901760, %v2954_v40 }
  0x1f   : > { %2491 = vmatpush3.bf16.msra.mxu1 %v2490_v1  ;;  %v2492_v30 = vpack.c.bf16 %v494_v13, %v487_v8  ;;  %2471 = vmatpush3.bf16.msra.mxu0 %v3016_v16  ;;  %v3986_v34 = vand.u32 4294901760, %v2960_v43  ;;  %v269_v37 = vand.u32 4294901760, %v181_v11  ;;  %v3032_v42 = vsub.f32 %v180_v56, %v266_v4  ;;  %v199_v56 = vld [vmem:[%s3978_s1 + $0xd0] sm:$0xff] }
  0x20   : > { %v375_v47 = vand.u32 4294901760, %v374_v18  ;;  %v382_v48 = vand.u32 4294901760, %v381_v19  ;;  %v3034_v49 = vpack.c.bf16 %v320_v24, %v317_v23  ;;  %v3036_v50 = vsub.f32 %v197_v5, %v317_v23  ;;  %v183_v1 = vld [vmem:[%s3978_s1 + $0x50] sm:$0xff]  ;;  %v184_v18 = vld [vmem:[%s3978_s1 + $0x58] sm:$0xff] }
  0x21   : > { %2493 = vmatprep.subr.bf16.mxu1 %v2492_v30  ;;  %v500_v51 = vsub.f32 %v2954_v40, %v3988_v33  ;;  %v507_v52 = vsub.f32 %v2960_v43, %v3986_v34  ;;  %v272_v55 = vand.u32 4294901760, %v182_v29  ;;  %v3051_v60 = vsub.f32 %v198_v6, %v320_v24 }
  0x22   : > { %v2494_v59 = vpack.c.bf16 %v382_v48, %v375_v47  ;;  %2473 = vmatprep.subr.bf16.mxu0 %v3034_v49  ;;  %v3985_v61 = vand.u32 4294901760, %v2965_v46  ;;  %v3983_v0 = vand.u32 4294901760, %v2989_v58  ;;  %v3060_v5 = vsub.f32 %v181_v11, %v269_v37 }
  0x23   : > { %v501_v2 = vand.u32 4294901760, %v500_v51  ;;  %v508_v3 = vand.u32 4294901760, %v507_v52  ;;  %v3058_v4 = vpack.c.bf16 %v272_v55, %v269_v37  ;;  %v323_v8 = vand.u32 4294901760, %v199_v56 }
  0x24   : > { %2495 = vmatpush3.bf16.msra.mxu1 %v2494_v59  ;;  %v388_v6 = vsub.f32 %v2965_v46, %v3985_v61  ;;  %v395_v7 = vsub.f32 %v2989_v58, %v3983_v0  ;;  %v326_v13 = vand.u32 4294901760, %v200_v57  ;;  %v3982_v11 = vand.u32 4294901760, %v2993_v63 }
  0x25   : > { %v2496_v19 = vpack.c.bf16 %v508_v3, %v501_v2  ;;  %2475 = vmatpush3.bf16.msra.mxu0 %v3058_v4  ;;  %v3981_v23 = vand.u32 4294901760, %v3014_v12  ;;  %v275_v24 = vand.u32 4294901760, %v183_v1  ;;  %v3080_v30 = vsub.f32 %v182_v29, %v272_v55  ;;  %v201_v29 = vld [vmem:[%s3978_s1 + $0xe0] sm:$0xff]  ;;  %v202_v55 = vld [vmem:[%s3978_s1 + $0xe8] sm:$0xff] }
  0x26   : > { %v389_v37 = vand.u32 4294901760, %v388_v6  ;;  %v396_v47 = vand.u32 4294901760, %v395_v7  ;;  %v3082_v48 = vpack.c.bf16 %v326_v13, %v323_v8  ;;  %v3084_v51 = vsub.f32 %v199_v56, %v323_v8  ;;  %v185_v8 = vld [vmem:[%s3978_s1 + $0x60] sm:$0xff] }
  0x27   : > { %2497 = vmatprep.subr.bf16.mxu1 %v2496_v19  ;;  %v514_v52 = vsub.f32 %v2993_v63, %v3982_v11  ;;  %v521_v59 = vsub.f32 %v3014_v12, %v3981_v23  ;;  %v278_v2 = vand.u32 4294901760, %v184_v18  ;;  %v3099_v3 = vsub.f32 %v200_v57, %v326_v13 }
  0x28   : > { %v2498_v56 = vpack.c.bf16 %v396_v47, %v389_v37  ;;  %2477 = vmatprep.subr.bf16.mxu0 %v3082_v48  ;;  %v3984_v6 = vand.u32 4294901760, %v3018_v17  ;;  %v3987_v7 = vand.u32 4294901760, %v3032_v42  ;;  %v3108_v0 = vsub.f32 %v183_v1, %v275_v24  ;;  %v186_v1 = vld [vmem:[%s3978_s1 + $0x68] sm:$0xff] }
  0x29   : > { %v515_v19 = vand.u32 4294901760, %v514_v52  ;;  %v522_v23 = vand.u32 4294901760, %v521_v59  ;;  %v3106_v11 = vpack.c.bf16 %v278_v2, %v275_v24  ;;  %v329_v37 = vand.u32 4294901760, %v201_v29 }
  0x2a   : > { %2499 = vmatpush3.bf16.msra.mxu1 %v2498_v56  ;;  %v402_v57 = vsub.f32 %v3018_v17, %v3984_v6  ;;  %v409_v13 = vsub.f32 %v3032_v42, %v3987_v7  ;;  %v332_v47 = vand.u32 4294901760, %v202_v55  ;;  %v3991_v52 = vand.u32 4294901760, %v3036_v50 }
  0x2b   : > { %4070 = vst [vmem:[#allocation2_spill] sm:$0xff] %v3106_v11  ;;  %v2500_v24 = vpack.c.bf16 %v522_v23, %v515_v19  ;;  %2479 = vmatpush3.bf16.msra.mxu0 %v3106_v11  ;;  %v3990_v59 = vand.u32 4294901760, %v3051_v60  ;;  %v281_v56 = vand.u32 4294901760, %v185_v8  ;;  %v3128_v6 = vsub.f32 %v184_v18, %v278_v2  ;;  %v203_v18 = vld [vmem:[%s3978_s1 + $0xf0] sm:$0xff]  ;;  %v204_v2 = vld [vmem:[%s3978_s1 + $0xf8] sm:$0xff] }
  0x2c   : > { %v403_v61 = vand.u32 4294901760, %v402_v57  ;;  %v410_v34 = vand.u32 4294901760, %v409_v13  ;;  %v3130_v7 = vpack.c.bf16 %v332_v47, %v329_v37  ;;  %v3132_v33 = vsub.f32 %v201_v29, %v329_v37 }
  0x2d   : > { %2501 = vmatprep.subr.bf16.mxu1 %v2500_v24  ;;  %v528_v23 = vsub.f32 %v3036_v50, %v3991_v52  ;;  %v535_v19 = vsub.f32 %v3051_v60, %v3990_v59  ;;  %v284_v10 = vand.u32 4294901760, %v186_v1  ;;  %v3148_v57 = vsub.f32 %v202_v55, %v332_v47  ;;  %v187_v24 = vld [vmem:[%s3978_s1 + $0x70] sm:$0xff] }
  0x2e   : > { %4071 = vst [vmem:[#allocation3_spill] sm:$0xff] %v3130_v7  ;;  %v2502_v29 = vpack.c.bf16 %v410_v34, %v403_v61  ;;  %2481 = vmatprep.subr.bf16.mxu0 %v3130_v7  ;;  %v3995_v13 = vand.u32 4294901760, %v3060_v5  ;;  %v3994_v37 = vand.u32 4294901760, %v3080_v30  ;;  %v3157_v54 = vsub.f32 %v185_v8, %v281_v56 }
  0x2f   : > { %v529_v59 = vand.u32 4294901760, %v528_v23  ;;  %v536_v52 = vand.u32 4294901760, %v535_v19  ;;  %v3155_v9 = vpack.c.bf16 %v284_v10, %v281_v56  ;;  %v335_v55 = vand.u32 4294901760, %v203_v18  ;;  %v188_v23 = vld [vmem:[%s3978_s1 + $0x78] sm:$0xff] }
  0x30   : > { %2503 = vmatpush3.bf16.msra.mxu1 %v2502_v29  ;;  %v416_v34 = vsub.f32 %v3060_v5, %v3995_v13  ;;  %v423_v61 = vsub.f32 %v3080_v30, %v3994_v37  ;;  %v338_v47 = vand.u32 4294901760, %v204_v2  ;;  %v4003_v56 = vand.u32 4294901760, %v3084_v51 }
  0x31   : > { %4072 = vst [vmem:[#allocation4_spill] sm:$0xff] %v3155_v9  ;;  %v2504_v8 = vpack.c.bf16 %v536_v52, %v529_v59  ;;  %2483 = vmatpush3.bf16.msra.mxu0 %v3155_v9  ;;  %v4004_v19 = vand.u32 4294901760, %v3099_v3  ;;  %v287_v29 = vand.u32 4294901760, %v187_v24  ;;  %v3176_v37 = vsub.f32 %v186_v1, %v284_v10 }
  0x32   : > { %v417_v13 = vand.u32 4294901760, %v416_v34  ;;  %v424_v53 = vand.u32 4294901760, %v423_v61  ;;  %v3178_v36 = vpack.c.bf16 %v338_v47, %v335_v55  ;;  %v3180_v35 = vsub.f32 %v203_v18, %v335_v55  ;;  %v169_v34 = vld [vmem:[%s3171_s5] sm:$0xff] }
  0x33   : > { %2505 = vmatprep.subr.bf16.mxu1 %v2504_v8  ;;  %v542_v52 = vsub.f32 %v3084_v51, %v4003_v56  ;;  %v549_v59 = vsub.f32 %v3099_v3, %v4004_v19  ;;  %v290_v44 = vand.u32 4294901760, %v188_v23  ;;  %v3190_v10 = vsub.f32 %v204_v2, %v338_v47 }
  0x34   : > { %4073 = vst [vmem:[#allocation5_spill] sm:$0xff] %v3178_v36  ;;  %v2506_v9 = vpack.c.bf16 %v424_v53, %v417_v13  ;;  %2485 = vmatprep.subr.bf16.mxu0 %v3178_v36  ;;  %v4005_v1 = vand.u32 4294901760, %v3108_v0  ;;  %v4006_v18 = vand.u32 4294901760, %v3128_v6  ;;  %v3197_v56 = vsub.f32 %v187_v24, %v287_v29 }
  0x35   : > { %v543_v61 = vand.u32 4294901760, %v542_v52  ;;  %v550_v55 = vand.u32 4294901760, %v549_v59  ;;  %v3195_v8 = vpack.c.bf16 %v290_v44, %v287_v29  ;;  %v3205_v13 = vand.u32 4294901760, %v170_v41 }
  0x36   : > { %2507 = vmatpush3.bf16.msra.mxu1 %v2506_v9  ;;  %v430_v53 = vsub.f32 %v3108_v0, %v4005_v1  ;;  %v437_v2 = vsub.f32 %v3128_v6, %v4006_v18  ;;  %v4009_v47 = vand.u32 4294901760, %v3132_v33  ;;  %v4015_v52 = vand.u32 4294901760, %v3148_v57 }
  0x37   : > { %4074 = vst [vmem:[#allocation6_spill] sm:$0xff] %v3195_v8  ;;  %4075 = vst [vmem:[#allocation7_spill] sm:$0xff] %v3205_v13  ;;  %v2508_v19 = vpack.c.bf16 %v550_v55, %v543_v61  ;;  %2487 = vmatpush3.bf16.msra.mxu0 %v3195_v8  ;;  %v2520_v9 = vpack.c.bf16 %v2942_v32, %v2940_v31  ;;  %v3212_v24 = vand.u32 4294901760, %v169_v34  ;;  %581 = vmatprep.mubr.f32.mxu1 %v3205_v13 }
  0x38   : > { %v431_v29 = vand.u32 4294901760, %v430_v53  ;;  %v438_v59 = vand.u32 4294901760, %v437_v2  ;;  %v3215_v1 = vsub.f32 %v170_v41, %v3205_v13  ;;  %v556_v18 = vsub.f32 %v3132_v33, %v4009_v47 }
  0x39   : > { %2509 = vmatprep.subr.bf16.mxu1 %v2508_v19  ;;  %v563_v61 = vsub.f32 %v3148_v57, %v4015_v52  ;;  %2521 = vmatprep.subr.bf16.mxu0 %v2520_v9  ;;  %v3225_v55 = vsub.f32 %v169_v34, %v3212_v24  ;;  %v4014_v53 = vand.u32 4294901760, %v3157_v54  ;;  %v4016_v41 = vand.u32 4294901760, %v3176_v37 }
  0x3a   : > { %v3229_v2 = vsub.f32 %v188_v23, %v290_v44  ;;  %v2510_v8 = vpack.c.bf16 %v438_v59, %v431_v29  ;;  %v4017_v47 = vand.u32 4294901760, %v3215_v1  ;;  %v557_v36 = vand.u32 4294901760, %v556_v18 }
  0x3b   : > { %v564_v13 = vand.u32 4294901760, %v563_v61  ;;  %v348_v19 = vand.u32 4294901760, %v3225_v55  ;;  %v444_v9 = vsub.f32 %v3157_v54, %v4014_v53  ;;  %v451_v34 = vsub.f32 %v3176_v37, %v4016_v41 }
  0x3c   : > { %2511 = vmatpush3.bf16.msra.mxu1 %v2510_v8  ;;  %v343_v44 = vsub.f32 %v3215_v1, %v4017_v47  ;;  %v2522_v23 = vpack.c.bf16 %v2920_v21, %v2910_v15  ;;  %v4022_v18 = vand.u32 4294901760, %v3180_v35  ;;  %v4025_v29 = vand.u32 4294901760, %v3190_v10 }
  0x3d   : > { %v2512_v59 = vpack.c.bf16 %v564_v13, %v557_v36  ;;  %v349_v61 = vsub.f32 %v3225_v55, %v348_v19  ;;  %v445_v53 = vand.u32 4294901760, %v444_v9  ;;  %v452_v52 = vand.u32 4294901760, %v451_v34 }
  0x3e   : > { %v344_v41 = vand.u32 4294901760, %v343_v44  ;;  %v570_v8 = vsub.f32 %v3180_v35, %v4022_v18  ;;  %v577_v47 = vsub.f32 %v3190_v10, %v4025_v29  ;;  %v4024_v7 = vand.u32 4294901760, %v3197_v56 }
  0x3f   : > { %2513 = vmatprep.subr.bf16.mxu1 %v2512_v59  ;;  %v350_v11 = vand.u32 4294901760, %v349_v61  ;;  %v2514_v36 = vpack.c.bf16 %v452_v52, %v445_v53  ;;  %v2524_v13 = vpack.c.bf16 %v2933_v26, %v2931_v25  ;;  %v4023_v9 = vand.u32 4294901760, %v3229_v2 }
  0x40   : > { %345 = vmatprep.mubr.f32.mxu0 %v344_v41  ;;  %v571_v34 = vand.u32 4294901760, %v570_v8  ;;  %v578_v44 = vand.u32 4294901760, %v577_v47  ;;  %v458_v18 = vsub.f32 %v3197_v56, %v4024_v7  ;;  %v2526_v61 = vpack.c.bf16 %v2950_v38, %v2937_v28 }
  0x41   : > { %351 = vmatmul.mubr.f32.vlgmr.msra.gmra.mrb[0].mxu0 %v350_v11  ;;  %2515 = vmatpush3.bf16.msra.mxu1 %v2514_v36  ;;  %v465_v59 = vsub.f32 %v3229_v2, %v4023_v9  ;;  %v2528_v41 = vpack.c.bf16 %v2960_v43, %v2954_v40  ;;  %v2530_v11 = vpack.c.bf16 %v2989_v58, %v2965_v46  ;;  %v4077_v36 = vand.u32 4294901760, %v2942_v32 }
  0x42   : > { %2523 = vmatpush3.bf16.msra.mxu0 %v2522_v23  ;;  %v2516_v52 = vpack.c.bf16 %v578_v44, %v571_v34  ;;  %v459_v53 = vand.u32 4294901760, %v458_v18  ;;  %718 = vmatprep.mubr.f32.mxu0 %v3215_v1  ;;  %v2532_v8 = vpack.c.bf16 %v3014_v12, %v2993_v63  ;;  %v4076_v18 = vand.u32 4294901760, %v2940_v31 }
  0x43   : > { %2525 = vmatprep.subr.bf16.mxu0 %v2524_v13  ;;  %v466_v47 = vand.u32 4294901760, %v465_v59  ;;  %v4078_v44 = vand.u32 4294901760, %v2910_v15  ;;  %v4079_v13 = vand.u32 4294901760, %v2920_v21  ;;  %v4080_v9 = vand.u32 4294901760, %v2931_v25 }
  0x44   : > { %2517 = vmatprep.subr.bf16.mxu1 %v2516_v52  ;;  %v2584_v34 = vpack.c.bf16 %v4077_v36, %v4076_v18  ;;  %v4081_v52 = vand.u32 4294901760, %v2933_v26  ;;  %v4082_v29 = vand.u32 4294901760, %v2937_v28  ;;  %v4084_v31 = vand.u32 4294901760, %v2954_v40 }
  0x45   : > { %v2518_v23 = vpack.c.bf16 %v466_v47, %v459_v53  ;;  %v2586_v59 = vpack.c.bf16 %v4079_v13, %v4078_v44  ;;  %v4083_v53 = vand.u32 4294901760, %v2950_v38  ;;  %v4085_v32 = vand.u32 4294901760, %v2960_v43  ;;  %v4099_v13 = vld [vmem:[#allocation7_spill] sm:$0xff] }
  0x46   : > { %v2588_v7 = vpack.c.bf16 %v4081_v52, %v4080_v9  ;;  %2527 = vmatpush3.bf16.msra.mxu0 %v2526_v61  ;;  %v4086_v15 = vand.u32 4294901760, %v2965_v46  ;;  %v4087_v21 = vand.u32 4294901760, %v2989_v58  ;;  %v4088_v25 = vand.u32 4294901760, %v2993_v63  ;;  %v222_v52 = vld [vmem:[%s3978_s1 + $0x188] sm:$0xff] }
  0x47   : > { %v2590_v47 = vpack.c.bf16 %v4083_v53, %v4082_v29  ;;  %v2592_v18 = vpack.c.bf16 %v4085_v32, %v4084_v31  ;;  %v4089_v26 = vand.u32 4294901760, %v3014_v12  ;;  %2519 = vmatpush3.bf16.msra.mxu1 %v2518_v23  ;;  %2529 = vmatprep.subr.bf16.mxu0 %v2528_v41  ;;  %v4090_v28 = vand.u32 4294901760, %v3018_v17  ;;  %v205_v53 = vld [vmem:[%s3978_s1 + $0x100] sm:$0xff]  ;;  %v4100_v31 = vld [vmem:[#allocation4_spill] sm:$0xff]  ;;  %v4101_v32 = vld [vmem:[#allocation5_spill] sm:$0xff] }
  0x48   : > { %v3298_v36 = vpack.c.bf16 %v4087_v21, %v4086_v15  ;;  %v4091_v38 = vand.u32 4294901760, %v3032_v42  ;;  %v4092_v43 = vand.u32 4294901760, %v3036_v50  ;;  %v4093_v46 = vand.u32 4294901760, %v3051_v60  ;;  %2553 = vmatprep.subr.bf16.mxu1 %v2908_v14 }
  0x49   : > { %v3304_v9 = vpack.c.bf16 %v4089_v26, %v4088_v25  ;;  %v4094_v63 = vand.u32 4294901760, %v3060_v5  ;;  %v4095_v12 = vand.u32 4294901760, %v3080_v30  ;;  %v2534_v61 = vpack.c.bf16 %v3032_v42, %v3018_v17  ;;  %v4102_v26 = vld [vmem:[#allocation6_spill] sm:$0xff] }
  0x4a   : > { %v3310_v40 = vpack.c.bf16 %v4091_v38, %v4090_v28  ;;  %v3316_v58 = vpack.c.bf16 %v4093_v46, %v4092_v43  ;;  %583 = vmatmul.mubr.f32.vlgmr.msra.gmra.mrb[0].mxu1 %v3212_v24  ;;  %2531 = vmatpush3.bf16.msra.mxu0 %v2530_v11  ;;  %v2536_v41 = vpack.c.bf16 %v3051_v60, %v3036_v50  ;;  %v4096_v23 = vand.u32 4294901760, %v3215_v1  ;;  %v4097_v1 = vld [vmem:[#allocation2_spill] sm:$0xff]  ;;  %v4098_v11 = vld [vmem:[#allocation3_spill] sm:$0xff]  ;;  %v223_v28 = vld [vmem:[%s3978_s1 + $0x190] sm:$0xff] }
  0x4b   : > { %v3322_v29 = vpack.c.bf16 %v4095_v12, %v4094_v63  ;;  %2555 = vmatpush3.bf16.msra.mxu1 %v2918_v20  ;;  %2533 = vmatprep.subr.bf16.mxu0 %v2532_v8  ;;  %v2538_v44 = vpack.c.bf16 %v3080_v30, %v3060_v5  ;;  %v2540_v17 = vpack.c.bf16 %v3099_v3, %v3084_v51  ;;  %v221_v8 = vld [vmem:[%s3978_s1 + $0x180] sm:$0xff]  ;;  %v1158_v15 = vand.u32 4294901760, %v222_v52  ;;  %v224_v38 = vld [vmem:[%s3978_s1 + $0x198] sm:$0xff]  ;;  %v207_v43 = vld [vmem:[%s3978_s1 + $0x110] sm:$0xff] }
  0x4c   : > { %2557 = vmatprep.subr.bf16.mxu1 %v2922_v22  ;;  %825 = vmatprep.mubr.f32.mxu1 %v4096_v23  ;;  %v2542_v42 = vpack.c.bf16 %v3128_v6, %v3108_v0  ;;  %v2544_v50 = vpack.c.bf16 %v3148_v57, %v3132_v33  ;;  %v2546_v60 = vpack.c.bf16 %v3176_v37, %v3157_v54  ;;  %v1107_v21 = vand.u32 4294901760, %v205_v53 }
  0x4d   : > { %v2548_v5 = vpack.c.bf16 %v3190_v10, %v3180_v35  ;;  %v2550_v30 = vpack.c.bf16 %v3229_v2, %v3197_v56  ;;  %v4104_v12 = vand.u32 4294901760, %v3099_v3  ;;  %v1164_v23 = vand.u32 4294901760, %v224_v38 }
  0x4e   : > { %2535 = vmatpush3.bf16.msra.mxu0 %v2534_v61  ;;  %v3392_v46 = vsub.f32 %v205_v53, %v1107_v21  ;;  %v1113_v3 = vand.u32 4294901760, %v207_v43 }
  0x4f   : > { %2559 = vmatpush3.bf16.msra.mxu1 %v2935_v27  ;;  %2537 = vmatprep.subr.bf16.mxu0 %v2536_v41  ;;  %v1161_v41 = vand.u32 4294901760, %v223_v28 }
  0x50   : > { %2561 = vmatprep.subr.bf16.mxu1 %v2952_v39 }
  0x51   : > { %v3457_v53 = vpack.c.bf16 %v1164_v23, %v1161_v41 }
  0x52   : > { %2539 = vmatpush3.bf16.msra.mxu0 %v2538_v44  ;;  %v4105_v44 = vand.u32 4294901760, %v3108_v0  ;;  %v4109_v0 = vand.u32 4294901760, %v3157_v54  ;;  %v172_v54 = vld [vmem:[%s3171_s5 + $0x18] sm:$0xff] }
  0x53   : > { %2563 = vmatpush3.bf16.msra.mxu1 %v2963_v45  ;;  %2541 = vmatprep.subr.bf16.mxu0 %v2540_v17  ;;  %v4106_v17 = vand.u32 4294901760, %v3128_v6  ;;  %4115 = vst [vmem:[#allocation2_spill] sm:$0xff] %v3457_v53 }
  0x54   : > { %2565 = vmatprep.subr.bf16.mxu1 %v2991_v62 }
  0x56   : > { %2543 = vmatpush3.bf16.msra.mxu0 %v2542_v42 }
  0x57   : > { %2567 = vmatpush3.bf16.msra.mxu1 %v3016_v16  ;;  %2545 = vmatprep.subr.bf16.mxu0 %v2544_v50  ;;  %v225_v50 = vld [vmem:[%s3978_s1 + $0x1a0] sm:$0xff] }
  0x58   : > { %2569 = vmatprep.subr.bf16.mxu1 %v3034_v49 }
  0x5a   : > { %2547 = vmatpush3.bf16.msra.mxu0 %v2546_v60 }
  0x5b   : > { %2571 = vmatpush3.bf16.msra.mxu1 %v3058_v4  ;;  %2549 = vmatprep.subr.bf16.mxu0 %v2548_v5  ;;  %v4113_v5 = vand.u32 4294901760, %v3197_v56  ;;  %v210_v56 = vld [vmem:[%s3978_s1 + $0x128] sm:$0xff] }
  0x5c   : > { %2573 = vmatprep.subr.bf16.mxu1 %v3082_v48 }
  0x5e   : > { %2551 = vmatpush3.bf16.msra.mxu0 %v2550_v30  ;;  %v4114_v30 = vand.u32 4294901760, %v3229_v2 }
  0x5f   : > { %2575 = vmatpush3.bf16.msra.mxu1 %v4097_v1  ;;  %2585 = vmatprep.subr.bf16.mxu0 %v2584_v34  ;;  %v206_v34 = vld [vmem:[%s3978_s1 + $0x108] sm:$0xff] }
  0x60   : > { %2577 = vmatprep.subr.bf16.mxu1 %v4098_v11  ;;  %v1110_v25 = vand.u32 4294901760, %v206_v34 }
  0x61   : > { %721 = vmatmul.mubr.f32.vlgmr.msra.gmra.mrb[2].mxu0 %v3225_v55  ;;  %v2606_v55 = vpack.c.bf16 %v4106_v17, %v4105_v44  ;;  %v3467_v44 = vand.u32 4294901760, %v172_v54 }
  0x62   : > { %2587 = vmatpush3.bf16.msra.mxu0 %v2586_v59  ;;  %995 = vmatprep.mubr.f32.mxu0 %v4099_v13  ;;  %v1155_v59 = vand.u32 4294901760, %v221_v8  ;;  %v3394_v63 = vsub.f32 %v206_v34, %v1110_v25  ;;  %v1167_v34 = vand.u32 4294901760, %v225_v50 }
  0x63   : > { %2579 = vmatpush3.bf16.msra.mxu1 %v4100_v31  ;;  %2589 = vmatprep.subr.bf16.mxu0 %v2588_v7  ;;  %4117 = vst [vmem:[#allocation7_spill] sm:$0xff] %v3467_v44 }
  0x64   : > { %2581 = vmatprep.subr.bf16.mxu1 %v4101_v32  ;;  %v3382_v7 = vsub.f32 %v221_v8, %v1155_v59  ;;  %v3438_v8 = vpack.c.bf16 %v4114_v30, %v4113_v5  ;;  %v4033_v2 = vand.u32 4294901760, %v3394_v63  ;;  %v3495_v17 = vsub.f32 %v225_v50, %v1167_v34  ;;  %v212_v50 = vld [vmem:[%s3978_s1 + $0x138] sm:$0xff] }
  0x66   : > { %2591 = vmatpush3.bf16.msra.mxu0 %v2590_v47  ;;  %v208_v47 = vld [vmem:[%s3978_s1 + $0x118] sm:$0xff] }
  0x67   : > { %2583 = vmatpush3.bf16.msra.mxu1 %v4102_v26  ;;  %2593 = vmatprep.subr.bf16.mxu0 %v2592_v18  ;;  %v3390_v18 = vsub.f32 %v222_v52, %v1158_v15  ;;  %v1116_v42 = vand.u32 4294901760, %v208_v47 }
  0x68   : > { %2617 = vmatprep.subr.bf16.mxu1 %v2908_v14  ;;  %v4103_v14 = vand.u32 4294901760, %v3084_v51 }
  0x69   : > { %v4035_v52 = vand.u32 4294901760, %v3390_v18 }
  0x6a   : > { %829 = vmatmul.mubr.f32.vlgmr.msra.gmra.mrb[2].mxu1 %v348_v19  ;;  %2595 = vmatpush3.bf16.msra.mxu0 %v3298_v36  ;;  %v2604_v61 = vpack.c.bf16 %v4104_v12, %v4103_v14  ;;  %v4107_v19 = vand.u32 4294901760, %v3132_v33  ;;  %v4108_v36 = vand.u32 4294901760, %v3148_v57  ;;  %v4110_v33 = vand.u32 4294901760, %v3176_v37 }
  0x6b   : > { %2619 = vmatpush3.bf16.msra.mxu1 %v2918_v20  ;;  %2597 = vmatprep.subr.bf16.mxu0 %v3304_v9  ;;  %v226_v20 = vld [vmem:[%s3978_s1 + $0x1a8] sm:$0xff]  ;;  %v4111_v57 = vand.u32 4294901760, %v3180_v35  ;;  %v4112_v9 = vand.u32 4294901760, %v3190_v10  ;;  %v3443_v37 = vpack.c.bf16 %v1158_v15, %v1155_v59  ;;  %v209_v35 = vld [vmem:[%s3978_s1 + $0x120] sm:$0xff]  ;;  %v4034_v10 = vand.u32 4294901760, %v3392_v46 }
  0x6c   : > { %v3413_v51 = vpack.c.bf16 %v4108_v36, %v4107_v19  ;;  %2621 = vmatprep.subr.bf16.mxu1 %v2922_v22  ;;  %v3426_v6 = vpack.c.bf16 %v4110_v33, %v4109_v0  ;;  %1099 = vmatprep.mubr.f32.mxu1 %v4099_v13  ;;  %v4038_v22 = vand.u32 4294901760, %v3382_v7  ;;  %v3455_v13 = vpack.c.bf16 %v1110_v25, %v1107_v21 }
  0x6d   : > { %v3432_v60 = vpack.c.bf16 %v4112_v9, %v4111_v57  ;;  %v1170_v59 = vand.u32 4294901760, %v226_v20  ;;  %v3461_v15 = vsub.f32 %v223_v28, %v1161_v41  ;;  %v3463_v14 = vsub.f32 %v224_v38, %v1164_v23  ;;  %v228_v28 = vld [vmem:[%s3978_s1 + $0x1b8] sm:$0xff] }
  0x6e   : > { %2599 = vmatpush3.bf16.msra.mxu0 %v3310_v40  ;;  %v3465_v12 = vpack.c.bf16 %v1116_v42, %v1113_v3  ;;  %v3470_v40 = vsub.f32 %v207_v43, %v1113_v3  ;;  %v1334_v21 = vsub.f32 %v3382_v7, %v4038_v22  ;;  %v1119_v25 = vand.u32 4294901760, %v209_v35 }
  0x6f   : > { %2623 = vmatpush3.bf16.msra.mxu1 %v2935_v27  ;;  %2601 = vmatprep.subr.bf16.mxu0 %v3316_v58  ;;  %v1122_v27 = vand.u32 4294901760, %v210_v56  ;;  %v227_v58 = vld [vmem:[%s3978_s1 + $0x1b0] sm:$0xff]  ;;  %v3481_v38 = vsub.f32 %v208_v47, %v1116_v42  ;;  %v1222_v43 = vsub.f32 %v3392_v46, %v4034_v10  ;;  %v1229_v41 = vsub.f32 %v3394_v63, %v4033_v2 }
  0x70   : > { %4116 = vst [vmem:[#allocation3_spill] sm:$0xff] %v3465_v12  ;;  %2625 = vmatprep.subr.bf16.mxu1 %v2952_v39  ;;  %v1341_v39 = vsub.f32 %v3390_v18, %v4035_v52  ;;  %v3493_v23 = vpack.c.bf16 %v1170_v59, %v1167_v34  ;;  %v3497_v47 = vsub.f32 %v226_v20, %v1170_v59  ;;  %v1173_v36 = vand.u32 4294901760, %v227_v58 }
  0x71   : > { %v3500_v19 = vsub.f32 %v172_v54, %v3467_v44  ;;  %v1176_v3 = vand.u32 4294901760, %v228_v28  ;;  %v4029_v42 = vand.u32 4294901760, %v3461_v15  ;;  %v4028_v0 = vand.u32 4294901760, %v3463_v14 }
  0x72   : > { %2603 = vmatpush3.bf16.msra.mxu0 %v3322_v29  ;;  %4118 = vst [vmem:[#allocation4_spill] sm:$0xff] %v3493_v23  ;;  %v211_v29 = vld [vmem:[%s3978_s1 + $0x130] sm:$0xff]  ;;  %v1335_v20 = vand.u32 4294901760, %v1334_v21  ;;  %v3512_v33 = vpack.c.bf16 %v1122_v27, %v1119_v25  ;;  %v1342_v57 = vand.u32 4294901760, %v1341_v39  ;;  %v1223_v9 = vand.u32 4294901760, %v1222_v43 }
  0x73   : > { %2627 = vmatpush3.bf16.msra.mxu1 %v2963_v45  ;;  %2605 = vmatprep.subr.bf16.mxu0 %v2604_v61  ;;  %v3514_v45 = vsub.f32 %v209_v35, %v1119_v25  ;;  %v3516_v61 = vsub.f32 %v210_v56, %v1122_v27  ;;  %v1230_v5 = vand.u32 4294901760, %v1229_v41  ;;  %v4026_v30 = vand.u32 4294901760, %v3470_v40 }
  0x74   : > { %2629 = vmatprep.subr.bf16.mxu1 %v2991_v62  ;;  %4119 = vst [vmem:[#allocation5_spill] sm:$0xff] %v3512_v33  ;;  %v1125_v54 = vand.u32 4294901760, %v211_v29  ;;  %v1128_v34 = vand.u32 4294901760, %v212_v50  ;;  %v4027_v59 = vand.u32 4294901760, %v3481_v38  ;;  %v229_v62 = vld [vmem:[%s3978_s1 + $0x1c0] sm:$0xff]  ;;  %v4039_v21 = vand.u32 4294901760, %v3500_v19 }
  0x75   : > { %v3526_v35 = vpack.c.bf16 %v1176_v3, %v1173_v36  ;;  %v1355_v56 = vsub.f32 %v3463_v14, %v4028_v0  ;;  %v3535_v25 = vsub.f32 %v227_v58, %v1173_v36  ;;  %v3537_v27 = vsub.f32 %v228_v28, %v1176_v3 }
  0x76   : > { %2607 = vmatpush3.bf16.msra.mxu0 %v2606_v55  ;;  %v1348_v55 = vsub.f32 %v3461_v15, %v4029_v42  ;;  %v4030_v39 = vand.u32 4294901760, %v3497_v47  ;;  %v3544_v43 = vpack.c.bf16 %v1342_v57, %v1335_v20  ;;  %v3546_v41 = vpack.c.bf16 %v1230_v5, %v1223_v9  ;;  %v214_v42 = vld [vmem:[%s3978_s1 + $0x148] sm:$0xff] }
  0x77   : > { %2631 = vmatpush3.bf16.msra.mxu1 %v3016_v16  ;;  %2609 = vmatprep.subr.bf16.mxu0 %v3413_v51  ;;  %4120 = vst [vmem:[#allocation6_spill] sm:$0xff] %v3526_v35  ;;  %v230_v16 = vld [vmem:[%s3978_s1 + $0x1c8] sm:$0xff]  ;;  %v4032_v51 = vand.u32 4294901760, %v3495_v17  ;;  %v1179_v58 = vand.u32 4294901760, %v229_v62  ;;  %v3552_v28 = vpack.c.bf16 %v1128_v34, %v1125_v54  ;;  %v1243_v36 = vsub.f32 %v3481_v38, %v4027_v59 }
  0x78   : > { %2633 = vmatprep.subr.bf16.mxu1 %v3034_v49  ;;  %v1236_v49 = vsub.f32 %v3470_v40, %v4026_v30  ;;  %v4031_v3 = vand.u32 4294901760, %v3514_v45  ;;  %v1205_v20 = vsub.f32 %v3500_v19, %v4039_v21  ;;  %v1349_v57 = vand.u32 4294901760, %v1348_v55 }
  0x79   : > { %4121 = vst [vmem:[#allocation8_spill] sm:$0xff] %v3552_v28  ;;  %v1356_v9 = vand.u32 4294901760, %v1355_v56  ;;  %v1182_v5 = vand.u32 4294901760, %v230_v16  ;;  %v4036_v30 = vand.u32 4294901760, %v3516_v61  ;;  %v3568_v59 = vsub.f32 %v211_v29, %v1125_v54 }
  0x7a   : > { %2611 = vmatpush3.bf16.msra.mxu0 %v3426_v6  ;;  %v213_v6 = vld [vmem:[%s3978_s1 + $0x140] sm:$0xff]  ;;  %v3570_v0 = vsub.f32 %v212_v50, %v1128_v34  ;;  %v1237_v55 = vand.u32 4294901760, %v1236_v49  ;;  %v3578_v56 = vsub.f32 %v229_v62, %v1179_v58  ;;  %v4040_v29 = vand.u32 4294901760, %v3537_v27  ;;  %v231_v62 = vld [vmem:[%s3978_s1 + $0x1d0] sm:$0xff]  ;;  %v232_v49 = vld [vmem:[%s3978_s1 + $0x1d8] sm:$0xff] }
  0x7b   : > { %2635 = vmatpush3.bf16.msra.mxu1 %v3058_v4  ;;  %2613 = vmatprep.subr.bf16.mxu0 %v3432_v60  ;;  %v1362_v4 = vsub.f32 %v3495_v17, %v4032_v51  ;;  %v1369_v60 = vsub.f32 %v3497_v47, %v4030_v39  ;;  %v1244_v50 = vand.u32 4294901760, %v1243_v36  ;;  %v1131_v54 = vand.u32 4294901760, %v213_v6 }
  0x7c   : > { %2637 = vmatprep.subr.bf16.mxu1 %v3082_v48  ;;  %v4037_v48 = vand.u32 4294901760, %v3535_v25  ;;  %v1250_v34 = vsub.f32 %v3514_v45, %v4031_v3  ;;  %v1206_v39 = vand.u32 4294901760, %v1205_v20  ;;  %v3599_v36 = vpack.c.bf16 %v1182_v5, %v1179_v58  ;;  %v216_v58 = vld [vmem:[%s3978_s1 + $0x158] sm:$0xff] }
  0x7d   : > { %v1257_v3 = vsub.f32 %v3516_v61, %v4036_v30  ;;  %v3605_v51 = vsub.f32 %v230_v16, %v1182_v5  ;;  %v1363_v2 = vand.u32 4294901760, %v1362_v4  ;;  %v1370_v10 = vand.u32 4294901760, %v1369_v60 }
  0x7e   : > { %2615 = vmatpush3.bf16.msra.mxu0 %v3438_v8  ;;  %v3597_v8 = vpack.c.bf16 %v1356_v9, %v1349_v57  ;;  %4122 = vst [vmem:[#allocation9_spill] sm:$0xff] %v3599_v36  ;;  %v1134_v52 = vand.u32 4294901760, %v214_v42  ;;  %v1185_v20 = vand.u32 4294901760, %v231_v62  ;;  %v1188_v57 = vand.u32 4294901760, %v232_v49 }
  0x7f   : > { %2639 = vmatpush3.bf16.msra.mxu1 %v4097_v1  ;;  %2649 = vmatprep.subr.bf16.mxu0 %v3443_v37  ;;  %v215_v1 = vld [vmem:[%s3978_s1 + $0x150] sm:$0xff]  ;;  %v1383_v16 = vsub.f32 %v3537_v27, %v4040_v29  ;;  %v3621_v9 = vpack.c.bf16 %v1244_v50, %v1237_v55  ;;  %v3623_v5 = vsub.f32 %v213_v6, %v1131_v54  ;;  %v1251_v4 = vand.u32 4294901760, %v1250_v34  ;;  %v233_v55 = vld [vmem:[%s3978_s1 + $0x1e0] sm:$0xff] }
  0x80   : > { %2641 = vmatprep.subr.bf16.mxu1 %v4098_v11  ;;  %v1376_v11 = vsub.f32 %v3535_v25, %v4037_v48  ;;  %v1258_v30 = vand.u32 4294901760, %v1257_v3  ;;  %v1137_v48 = vand.u32 4294901760, %v215_v1  ;;  %v1140_v22 = vand.u32 4294901760, %v216_v58 }
  0x81   : > { %997 = vmatmul.mubr.f32.vlgmr.msra.gmra.mrb[4].mxu0 %v3212_v24  ;;  %v3633_v6 = vpack.c.bf16 %v1370_v10, %v1363_v2  ;;  %v3635_v50 = vpack.c.bf16 %v1134_v52, %v1131_v54  ;;  %v4041_v3 = vand.u32 4294901760, %v3578_v56  ;;  %v3643_v34 = vpack.c.bf16 %v1188_v57, %v1185_v20 }
  0x82   : > { %2651 = vmatpush3.bf16.msra.mxu0 %v3455_v13  ;;  %1207 = vmatprep.mubr.f32.mxu0 %v1206_v39  ;;  %v3637_v39 = vsub.f32 %v214_v42, %v1134_v52  ;;  %v1377_v29 = vand.u32 4294901760, %v1376_v11  ;;  %v1384_v21 = vand.u32 4294901760, %v1383_v16  ;;  %v3652_v52 = vsub.f32 %v231_v62, %v1185_v20 }
  0x83   : > { %2643 = vmatpush3.bf16.msra.mxu1 %v4100_v31  ;;  %2653 = vmatprep.subr.bf16.mxu0 %v3457_v53  ;;  %v234_v31 = vld [vmem:[%s3978_s1 + $0x1e8] sm:$0xff]  ;;  %4124 = vst [vmem:[#allocation11_spill] sm:$0xff] %v3643_v34  ;;  %v3654_v10 = vsub.f32 %v232_v49, %v1188_v57  ;;  %v4127_v2 = vand.u32 4294901760, %v3568_v59  ;;  %v1191_v54 = vand.u32 4294901760, %v233_v55  ;;  %v3661_v11 = vpack.c.bf16 %v1258_v30, %v1251_v4 }
  0x84   : > { %2645 = vmatprep.subr.bf16.mxu1 %v4101_v32  ;;  %4123 = vst [vmem:[#allocation10_spill] sm:$0xff] %v3637_v39  ;;  %v3649_v32 = vld [vmem:[%s3978_s1 + $0x160] sm:$0xff]  ;;  %4125 = vst [vmem:[#allocation12_spill] sm:$0xff] %v3652_v52  ;;  %v3663_v16 = vpack.c.bf16 %v1140_v22, %v1137_v48  ;;  %v4128_v60 = vand.u32 4294901760, %v3570_v0  ;;  %v1194_v20 = vand.u32 4294901760, %v234_v31  ;;  %v3669_v49 = vsub.f32 %v215_v1, %v1137_v48  ;;  %v3679_v30 = vld [vmem:[%s3978_s1 + $0x168] sm:$0xff] }
  0x85   : > { %4126 = vst [vmem:[#allocation13_spill] sm:$0xff] %v3654_v10  ;;  %v1264_v42 = vsub.f32 %v3568_v59, %v4127_v2  ;;  %v3671_v57 = vsub.f32 %v216_v58, %v1140_v22  ;;  %v4129_v2 = vand.u32 4294901760, %v3605_v51  ;;  %v3690_v1 = vld [vmem:[%s3978_s1 + $0x1f0] sm:$0xff]  ;;  %v3695_v58 = vld [vmem:[%s3978_s1 + $0x1f8] sm:$0xff]  ;;  %v4134_v53 = vand.u32 4294901760, %v3654_v10 }
  0x86   : > { %2655 = vmatpush3.bf16.msra.mxu0 %v3465_v12  ;;  %v1271_v62 = vsub.f32 %v3570_v0, %v4128_v60  ;;  %v2692_v60 = vpack.c.bf16 %v1384_v21, %v1377_v29  ;;  %v3699_v29 = vsub.f32 %v233_v55, %v1191_v54  ;;  %v171_v48 = vld [vmem:[%s3171_s5 + $0x10] sm:$0xff]  ;;  %v3706_v4 = vpack.c.bf16 %v1194_v20, %v1191_v54 }
  0x87   : > { %2647 = vmatpush3.bf16.msra.mxu1 %v4102_v26  ;;  %2657 = vmatprep.subr.bf16.mxu0 %v3493_v23  ;;  %v1390_v26 = vsub.f32 %v3578_v56, %v4041_v3  ;;  %v1265_v21 = vand.u32 4294901760, %v1264_v42  ;;  %v3708_v23 = vsub.f32 %v234_v31, %v1194_v20  ;;  %v4130_v42 = vand.u32 4294901760, %v3649_v32  ;;  %v3722_v54 = vld [vmem:[%s3978_s1 + $0x170] sm:$0xff]  ;;  %v3727_v31 = vld [vmem:[%s3978_s1 + $0x178] sm:$0xff] }
  0x88   : > { %2681 = vmatprep.subr.bf16.mxu1 %v3544_v43  ;;  %v1397_v43 = vsub.f32 %v3605_v51, %v4129_v2  ;;  %v1272_v22 = vand.u32 4294901760, %v1271_v62  ;;  %v1197_v3 = vand.u32 4294901760, %v3690_v1  ;;  %v4131_v62 = vand.u32 4294901760, %v3623_v5 }
  0x89   : > { %v1391_v55 = vand.u32 4294901760, %v1390_v26  ;;  %v3715_v2 = vsub.f32 %v3649_v32, %v4130_v42  ;;  %v4132_v26 = vand.u32 4294901760, %v3637_v39 }
  0x8a   : > { %1101 = vmatmul.mubr.f32.vlgmr.msra.gmra.mrb[4].mxu1 %v3212_v24  ;;  %2659 = vmatpush3.bf16.msra.mxu0 %v3512_v33  ;;  %v1146_v24 = vand.u32 4294901760, %v3679_v30  ;;  %v1278_v20 = vsub.f32 %v3623_v5, %v4131_v62  ;;  %v4133_v33 = vand.u32 4294901760, %v3652_v52  ;;  %v4066_v62 = vand.u32 4294901760, %v3708_v23 }
  0x8b   : > { %2683 = vmatpush3.bf16.msra.mxu1 %v3546_v41  ;;  %2661 = vmatprep.subr.bf16.mxu0 %v3526_v35  ;;  %v1200_v41 = vand.u32 4294901760, %v3695_v58  ;;  %v1285_v42 = vsub.f32 %v3637_v39, %v4132_v26  ;;  %v3736_v35 = vand.u32 4294901760, %v171_v48  ;;  %v2694_v26 = vpack.c.bf16 %v1272_v22, %v1265_v21 }
  0x8c   : > { %2685 = vmatprep.subr.bf16.mxu1 %v3597_v8  ;;  %1443 = vmatprep.mubr.f32.mxu1 %v3467_v44  ;;  %v1398_v8 = vand.u32 4294901760, %v1397_v43  ;;  %v1404_v12 = vsub.f32 %v3652_v52, %v4133_v33  ;;  %v1411_v43 = vsub.f32 %v3654_v10, %v4134_v53  ;;  %v3750_v39 = vsub.f32 %v3679_v30, %v1146_v24 }
  0x8d   : > { %v1152_v33 = vand.u32 4294901760, %v3727_v31  ;;  %v3756_v53 = vsub.f32 %v3690_v1, %v1197_v3  ;;  %v3759_v44 = vsub.f32 %v3695_v58, %v1200_v41  ;;  %v1279_v21 = vand.u32 4294901760, %v1278_v20 }
  0x8e   : > { %2663 = vmatpush3.bf16.msra.mxu0 %v3552_v28  ;;  %v1149_v28 = vand.u32 4294901760, %v3722_v54  ;;  %v2696_v22 = vpack.c.bf16 %v1398_v8, %v1391_v55  ;;  %v1286_v30 = vand.u32 4294901760, %v1285_v42  ;;  %v1405_v10 = vand.u32 4294901760, %v1404_v12 }
  0x8f   : > { %2687 = vmatpush3.bf16.msra.mxu1 %v3621_v9  ;;  %2665 = vmatprep.subr.bf16.mxu0 %v3599_v36  ;;  %v3764_v36 = vsub.f32 %v171_v48, %v3736_v35  ;;  %v4135_v1 = vand.u32 4294901760, %v3669_v49  ;;  %v4136_v58 = vand.u32 4294901760, %v3671_v57  ;;  %v3779_v48 = vsub.f32 %v3727_v31, %v1152_v33 }
  0x90   : > { %2689 = vmatprep.subr.bf16.mxu1 %v3633_v6  ;;  %v1412_v6 = vand.u32 4294901760, %v1411_v43  ;;  %v3776_v55 = vsub.f32 %v3722_v54, %v1149_v28  ;;  %v4137_v20 = vand.u32 4294901760, %v3699_v29  ;;  %v1431_v43 = vand.u32 4294901760, %v3756_v53 }
  0x91   : > { %v1292_v52 = vsub.f32 %v3669_v49, %v4135_v1  ;;  %v1299_v9 = vsub.f32 %v3671_v57, %v4136_v58  ;;  %v4138_v31 = vand.u32 4294901760, %v3649_v32  ;;  %v3795_v58 = vpack.c.bf16 %v1200_v41, %v1197_v3 }
  0x92   : > { %2667 = vmatpush3.bf16.msra.mxu0 %v3635_v50  ;;  %v1418_v42 = vsub.f32 %v3699_v29, %v4137_v20  ;;  %v2698_v8 = vpack.c.bf16 %v1286_v30, %v1279_v21  ;;  %v2700_v20 = vpack.c.bf16 %v1412_v6, %v1405_v10  ;;  %v4140_v32 = vand.u32 4294901760, %v3750_v39 }
  0x93   : > { %2691 = vmatpush3.bf16.msra.mxu1 %v3661_v11  ;;  %2669 = vmatprep.subr.bf16.mxu0 %v3643_v34  ;;  %v1425_v11 = vsub.f32 %v3708_v23, %v4066_v62  ;;  %v3793_v1 = vpack.c.bf16 %v1146_v24, %v4138_v31  ;;  %v1293_v12 = vand.u32 4294901760, %v1292_v52  ;;  %v1300_v34 = vand.u32 4294901760, %v1299_v9 }
  0x94   : > { %2693 = vmatprep.subr.bf16.mxu1 %v2692_v60  ;;  %v1210_v60 = vand.u32 4294901760, %v3764_v36  ;;  %v4139_v62 = vand.u32 4294901760, %v3715_v2  ;;  %v1313_v3 = vsub.f32 %v3750_v39, %v4140_v32  ;;  %v4067_v24 = vand.u32 4294901760, %v3776_v55 }
  0x95   : > { %v4068_v41 = vand.u32 4294901760, %v3779_v48  ;;  %v1419_v21 = vand.u32 4294901760, %v1418_v42  ;;  %v1426_v10 = vand.u32 4294901760, %v1425_v11  ;;  %v1432_v52 = vsub.f32 %v3756_v53, %v1431_v43 }
  0x96   : > { %2671 = vmatpush3.bf16.msra.mxu0 %v3663_v16  ;;  %v1306_v54 = vsub.f32 %v3715_v2, %v4139_v62  ;;  %v1211_v62 = vsub.f32 %v3764_v36, %v1210_v60  ;;  %v3818_v30 = vpack.c.bf16 %v1152_v33, %v1149_v28  ;;  %v2702_v6 = vpack.c.bf16 %v1300_v34, %v1293_v12 }
  0x97   : > { %2695 = vmatpush3.bf16.msra.mxu1 %v2694_v26  ;;  %2673 = vmatprep.subr.bf16.mxu0 %v3706_v4  ;;  %v4141_v26 = vand.u32 4294901760, %v3759_v44  ;;  %v1314_v11 = vand.u32 4294901760, %v1313_v3  ;;  %v1320_v31 = vsub.f32 %v3776_v55, %v4067_v24  ;;  %v1327_v32 = vsub.f32 %v3779_v48, %v4068_v41 }
  0x98   : > { %2697 = vmatprep.subr.bf16.mxu1 %v2696_v22  ;;  %v2712_v22 = vpack.c.bf16 %v3390_v18, %v3382_v7  ;;  %v1307_v42 = vand.u32 4294901760, %v1306_v54  ;;  %v2704_v28 = vpack.c.bf16 %v1426_v10, %v1419_v21  ;;  %v1433_v33 = vand.u32 4294901760, %v1432_v52 }
  0x99   : > { %v1439_v9 = vsub.f32 %v3759_v44, %v4141_v26  ;;  %v1212_v12 = vand.u32 4294901760, %v1211_v62  ;;  %v2716_v3 = vpack.c.bf16 %v3463_v14, %v3461_v15  ;;  %v1321_v26 = vand.u32 4294901760, %v1320_v31  ;;  %v4142_v62 = vld [vmem:[#allocation2_spill] sm:$0xff]  ;;  %v4146_v31 = vld [vmem:[#allocation12_spill] sm:$0xff] }
  0x9a   : > { %2675 = vmatpush3.bf16.msra.mxu0 %v3793_v1  ;;  %v2706_v54 = vpack.c.bf16 %v1314_v11, %v1307_v42  ;;  %v1328_v24 = vand.u32 4294901760, %v1327_v32  ;;  %v2720_v10 = vpack.c.bf16 %v3497_v47, %v3495_v17  ;;  %v2722_v52 = vpack.c.bf16 %v3516_v61, %v3514_v45  ;;  %v4145_v11 = vld [vmem:[#allocation3_spill] sm:$0xff]  ;;  %v4147_v32 = vld [vmem:[#allocation13_spill] sm:$0xff] }
  0x9b   : > { %2699 = vmatpush3.bf16.msra.mxu1 %v2698_v8  ;;  %2677 = vmatprep.subr.bf16.mxu0 %v3795_v58  ;;  %v1440_v34 = vand.u32 4294901760, %v1439_v9  ;;  %v2714_v8 = vpack.c.bf16 %v3394_v63, %v3392_v46  ;;  %v2724_v9 = vpack.c.bf16 %v3537_v27, %v3535_v25 }
  0x9c   : > { %2701 = vmatprep.subr.bf16.mxu1 %v2700_v20  ;;  %v2718_v20 = vpack.c.bf16 %v3481_v38, %v3470_v40  ;;  %v2710_v21 = vpack.c.bf16 %v1328_v24, %v1321_v26  ;;  %v2726_v24 = vpack.c.bf16 %v3570_v0, %v3568_v59  ;;  %v2740_v26 = vpack.c.bf16 %v3759_v44, %v3756_v53 }
  0x9d   : > { %v2708_v41 = vpack.c.bf16 %v1440_v34, %v1433_v33  ;;  %v4148_v33 = vld [vmem:[#allocation4_spill] sm:$0xff]  ;;  %v2734_v34 = vpack.c.bf16 %v3671_v57, %v3669_v49 }
  0x9e   : > { %2679 = vmatpush3.bf16.msra.mxu0 %v3818_v30 }
  0x9f   : > { %2703 = vmatpush3.bf16.msra.mxu1 %v2702_v6  ;;  %2713 = vmatprep.subr.bf16.mxu0 %v2712_v22  ;;  %v4143_v6 = vand.u32 4294901760, %v3500_v19  ;;  %v4144_v22 = vld [vmem:[#allocation10_spill] sm:$0xff] }
  0xa0   : > { %2705 = vmatprep.subr.bf16.mxu1 %v2704_v28  ;;  %v2730_v42 = vpack.c.bf16 %v4144_v22, %v3623_v5  ;;  %v2732_v28 = vpack.c.bf16 %v4147_v32, %v4146_v31 }
  0xa1   : > { %1213 = vmatmul.mubr.f32.vlgmr.msra.gmra.mrb[6].mxu0 %v1212_v12  ;;  %v4149_v12 = vld [vmem:[#allocation5_spill] sm:$0xff] }
  0xa2   : > { %2715 = vmatpush3.bf16.msra.mxu0 %v2714_v8  ;;  %1580 = vmatprep.mubr.f32.mxu0 %v3500_v19  ;;  %v2736_v19 = vpack.c.bf16 %v3708_v23, %v3699_v29  ;;  %v4150_v8 = vld [vmem:[#allocation6_spill] sm:$0xff] }
  0xa3   : > { %2707 = vmatpush3.bf16.msra.mxu1 %v2706_v54  ;;  %2717 = vmatprep.subr.bf16.mxu0 %v2716_v3  ;;  %v2738_v54 = vpack.c.bf16 %v3750_v39, %v3715_v2  ;;  %v4151_v3 = vld [vmem:[#allocation8_spill] sm:$0xff] }
  0xa4   : > { %2709 = vmatprep.subr.bf16.mxu1 %v2708_v41  ;;  %v2728_v41 = vpack.c.bf16 %v3605_v51, %v3578_v56 }
  0xa6   : > { %2719 = vmatpush3.bf16.msra.mxu0 %v2718_v20  ;;  %v4152_v20 = vld [vmem:[#allocation9_spill] sm:$0xff] }
  0xa7   : > { %2711 = vmatpush3.bf16.msra.mxu1 %v2710_v21  ;;  %2721 = vmatprep.subr.bf16.mxu0 %v2720_v10  ;;  %v2742_v21 = vpack.c.bf16 %v3779_v48, %v3776_v55  ;;  %v4153_v10 = vand.u32 4294901760, %v3382_v7  ;;  %v4160_v7 = vand.u32 4294901760, %v3470_v40  ;;  %v4166_v40 = vand.u32 4294901760, %v3516_v61 }
  0xa8   : > { %2745 = vmatprep.subr.bf16.mxu1 %v3443_v37  ;;  %v4171_v61 = vand.u32 4294901760, %v3578_v56 }
  0xaa   : > { %1445 = vmatmul.mubr.f32.vlgmr.msra.gmra.mrb[6].mxu1 %v3736_v35  ;;  %2723 = vmatpush3.bf16.msra.mxu0 %v2722_v52  ;;  %v4154_v52 = vand.u32 4294901760, %v3390_v18  ;;  %v4161_v18 = vand.u32 4294901760, %v3481_v38  ;;  %v4167_v38 = vand.u32 4294901760, %v3535_v25  ;;  %v4172_v25 = vand.u32 4294901760, %v3605_v51 }
  0xab   : > { %2747 = vmatpush3.bf16.msra.mxu1 %v3455_v13  ;;  %2725 = vmatprep.subr.bf16.mxu0 %v2724_v9  ;;  %v4177_v51 = vand.u32 4294901760, %v3669_v49  ;;  %v4183_v49 = vand.u32 4294901760, %v3759_v44 }
  0xac   : > { %2749 = vmatprep.subr.bf16.mxu1 %v4142_v62  ;;  %1687 = vmatprep.mubr.f32.mxu1 %v4143_v6  ;;  %v2776_v9 = vpack.c.bf16 %v4154_v52, %v4153_v10  ;;  %v4157_v6 = vand.u32 4294901760, %v3394_v63  ;;  %v4162_v63 = vld [vmem:[#allocation7_spill] sm:$0xff]  ;;  %v4168_v10 = vand.u32 4294901760, %v3537_v27  ;;  %v2792_v27 = vpack.c.bf16 %v4172_v25, %v4171_v61 }
  0xae   : > { %2727 = vmatpush3.bf16.msra.mxu0 %v2726_v24  ;;  %v4155_v24 = vld [vmem:[#allocation11_spill] sm:$0xff]  ;;  %v2788_v52 = vpack.c.bf16 %v4168_v10, %v4167_v38 }
  0xaf   : > { %2751 = vmatpush3.bf16.msra.mxu1 %v4145_v11  ;;  %2729 = vmatprep.subr.bf16.mxu0 %v2728_v41  ;;  %v4156_v41 = vand.u32 4294901760, %v3392_v46  ;;  %v2782_v46 = vpack.c.bf16 %v4161_v18, %v4160_v7 }
  0xb0   : > { %2753 = vmatprep.subr.bf16.mxu1 %v4148_v33 }
  0xb2   : > { %2731 = vmatpush3.bf16.msra.mxu0 %v2730_v42  ;;  %v2778_v42 = vpack.c.bf16 %v4157_v6, %v4156_v41 }
  0xb3   : > { %2755 = vmatpush3.bf16.msra.mxu1 %v4149_v12  ;;  %2733 = vmatprep.subr.bf16.mxu0 %v2732_v28  ;;  %v4158_v28 = vand.u32 4294901760, %v3461_v15  ;;  %v4163_v15 = vand.u32 4294901760, %v3495_v17  ;;  %v4169_v17 = vand.u32 4294901760, %v3568_v59  ;;  %v4174_v59 = vand.u32 4294901760, %v4144_v22 }
  0xb4   : > { %2757 = vmatprep.subr.bf16.mxu1 %v4150_v8  ;;  %v4180_v22 = vand.u32 4294901760, %v3708_v23  ;;  %v4184_v23 = vand.u32 4294901760, %v3776_v55 }
  0xb6   : > { %2735 = vmatpush3.bf16.msra.mxu0 %v2734_v34  ;;  %v4159_v34 = vand.u32 4294901760, %v3463_v14  ;;  %v4164_v14 = vand.u32 4294901760, %v3497_v47  ;;  %v4170_v47 = vand.u32 4294901760, %v3570_v0  ;;  %v4176_v0 = vand.u32 4294901760, %v4147_v32 }
  0xb7   : > { %2759 = vmatpush3.bf16.msra.mxu1 %v4151_v3  ;;  %2737 = vmatprep.subr.bf16.mxu0 %v2736_v19  ;;  %v4182_v32 = vand.u32 4294901760, %v3750_v39 }
  0xb8   : > { %2761 = vmatprep.subr.bf16.mxu1 %v4152_v20  ;;  %v2780_v19 = vpack.c.bf16 %v4159_v34, %v4158_v28 }
  0xba   : > { %2739 = vmatpush3.bf16.msra.mxu0 %v2738_v54  ;;  %v2784_v54 = vpack.c.bf16 %v4164_v14, %v4163_v15 }
  0xbb   : > { %2763 = vmatpush3.bf16.msra.mxu1 %v3635_v50  ;;  %2741 = vmatprep.subr.bf16.mxu0 %v2740_v26  ;;  %v4165_v26 = vand.u32 4294901760, %v3514_v45  ;;  %v2790_v45 = vpack.c.bf16 %v4170_v47, %v4169_v17 }
  0xbc   : > { %2765 = vmatprep.subr.bf16.mxu1 %v4155_v24 }
  0xbe   : > { %2743 = vmatpush3.bf16.msra.mxu0 %v2742_v21  ;;  %v2786_v21 = vpack.c.bf16 %v4166_v40, %v4165_v26 }
  0xbf   : > { %2767 = vmatpush3.bf16.msra.mxu1 %v3663_v16  ;;  %2777 = vmatprep.subr.bf16.mxu0 %v2776_v9 }
  0xc0   : > { %2769 = vmatprep.subr.bf16.mxu1 %v3706_v4 }
  0xc1   : > { %1583 = vmatmul.mubr.f32.vlgmr.msra.gmra.mrb[8].mxu0 %v3764_v36 }
  0xc2   : > { %2779 = vmatpush3.bf16.msra.mxu0 %v2778_v42  ;;  %1857 = vmatprep.mubr.f32.mxu0 %v4162_v63 }
  0xc3   : > { %2771 = vmatpush3.bf16.msra.mxu1 %v3793_v1  ;;  %2781 = vmatprep.subr.bf16.mxu0 %v2780_v19 }
  0xc4   : > { %2773 = vmatprep.subr.bf16.mxu1 %v3795_v58 }
  0xc6   : > { %2783 = vmatpush3.bf16.msra.mxu0 %v2782_v46 }
  0xc7   : > { %2775 = vmatpush3.bf16.msra.mxu1 %v3818_v30  ;;  %2785 = vmatprep.subr.bf16.mxu0 %v2784_v54 }
  0xc8   : > { %2809 = vmatprep.subr.bf16.mxu1 %v3443_v37  ;;  %v4173_v37 = vand.u32 4294901760, %v3623_v5  ;;  %v4179_v5 = vand.u32 4294901760, %v3699_v29  ;;  %v4185_v29 = vand.u32 4294901760, %v3779_v48 }
  0xca   : > { %1691 = vmatmul.mubr.f32.vlgmr.msra.gmra.mrb[8].mxu1 %v1210_v60  ;;  %2787 = vmatpush3.bf16.msra.mxu0 %v2786_v21  ;;  %v2794_v36 = vpack.c.bf16 %v4174_v59, %v4173_v37  ;;  %v4178_v60 = vand.u32 4294901760, %v3671_v57  ;;  %v2804_v57 = vpack.c.bf16 %v4183_v49, %v1431_v43 }
  0xcb   : > { %2811 = vmatpush3.bf16.msra.mxu1 %v3455_v13  ;;  %2789 = vmatprep.subr.bf16.mxu0 %v2788_v52  ;;  %v4175_v13 = vand.u32 4294901760, %v4146_v31  ;;  %v4181_v31 = vand.u32 4294901760, %v3715_v2  ;;  %v2032_v2 = vld [vmem:[%s3979_s2] ss:$0 sm:$0xff] }
  0xcc   : > { %2813 = vmatprep.subr.bf16.mxu1 %v4142_v62  ;;  %1961 = vmatprep.mubr.f32.mxu1 %v4162_v63  ;;  %v2798_v62 = vpack.c.bf16 %v4178_v60, %v4177_v51 }
  0xcd   : > { %v2796_v56 = vpack.c.bf16 %v4176_v0, %v4175_v13 }
  0xce   : > { %2791 = vmatpush3.bf16.msra.mxu0 %v2790_v45 }
  0xcf   : > { %2815 = vmatpush3.bf16.msra.mxu1 %v4145_v11  ;;  %2793 = vmatprep.subr.bf16.mxu0 %v2792_v27  ;;  %v2800_v11 = vpack.c.bf16 %v4180_v22, %v4179_v5 }
  0xd0   : > { %2817 = vmatprep.subr.bf16.mxu1 %v4148_v33  ;;  %v2802_v33 = vpack.c.bf16 %v4182_v32, %v4181_v31 }
  0xd2   : > { %2795 = vmatpush3.bf16.msra.mxu0 %v2794_v36 }
  0xd3   : > { %2819 = vmatpush3.bf16.msra.mxu1 %v4149_v12  ;;  %2797 = vmatprep.subr.bf16.mxu0 %v2796_v56  ;;  %v2806_v12 = vpack.c.bf16 %v4185_v29, %v4184_v23 }
  0xd4   : > { %2821 = vmatprep.subr.bf16.mxu1 %v4150_v8 }
  0xd6   : > { %2799 = vmatpush3.bf16.msra.mxu0 %v2798_v62 }
  0xd7   : > { %2823 = vmatpush3.bf16.msra.mxu1 %v4151_v3  ;;  %2801 = vmatprep.subr.bf16.mxu0 %v2800_v11 }
  0xd8   : > { %2825 = vmatprep.subr.bf16.mxu1 %v4152_v20 }
  0xda   : > { %2803 = vmatpush3.bf16.msra.mxu0 %v2802_v33 }
  0xdb   : > { %2827 = vmatpush3.bf16.msra.mxu1 %v3635_v50  ;;  %2805 = vmatprep.subr.bf16.mxu0 %v2804_v57 }
  0xdc   : > { %2829 = vmatprep.subr.bf16.mxu1 %v4155_v24 }
  0xde   : > { %2807 = vmatpush3.bf16.msra.mxu0 %v2806_v12 }
  0xdf   : > { %2831 = vmatpush3.bf16.msra.mxu1 %v3663_v16 }
  0xe0   : > { %2833 = vmatprep.subr.bf16.mxu1 %v3706_v4 }
  0xe1   : > { %1859 = vmatmul.mubr.f32.vlgmr.msra.gmra.mrb[10].mxu0 %v3736_v35 }
  0xe3   : > { %2835 = vmatpush3.bf16.msra.mxu1 %v3793_v1 }
  0xe4   : > { %2837 = vmatprep.subr.bf16.mxu1 %v3795_v58 }
  0xe7   : > { %2839 = vmatpush3.bf16.msra.mxu1 %v3818_v30 }
  0xea   : > { %1963 = vmatmul.mubr.f32.vlgmr.msra.gmra.mrb[10].mxu1 %v3736_v35 }
 0x114   : > { %v2068_v44 = vpop.f32.mrb[0].mxu0 }
 0x115   : > { %v2069_v50 = vpop.f32.mrb[1].mxu0 }
 0x116   : > { %v2070_v39 = vadd.f32 %v2069_v50, %v2068_v44 }
 0x118   : > { %v353_v16 = vadd.f32 %v2070_v39, %v2032_v2 }
 0x11d   : > { %v2103_v53 = vpop.f32.mrb[0].mxu1 }
 0x11e   : > { %v2104_v4 = vpop.f32.mrb[1].mxu1 }
 0x11f   : > { %v2105_v55 = vadd.f32 %v2104_v4, %v2103_v53 }
 0x121   : > { %v585_v48 = vadd.f32 %v2105_v55, %v353_v16 }
 0x134   : > { %v2138_v43 = vpop.f32.mrb[2].mxu0 }
 0x135   : > { %v2139_v1 = vpop.f32.mrb[3].mxu0 }
 0x136   : > { %v2140_v8 = vadd.f32 %v2139_v1, %v2138_v43 }
 0x138   : > { %v723_v58 = vadd.f32 %v2140_v8, %v585_v48 }
 0x13d   : > { %v2173_v3 = vpop.f32.mrb[2].mxu1 }
 0x13e   : > { %v2174_v30 = vpop.f32.mrb[3].mxu1 }
 0x13f   : > { %v2175_v20 = vadd.f32 %v2174_v30, %v2173_v3 }
 0x141   : > { %v831_v35 = vadd.f32 %v2175_v20, %v723_v58 }
 0x154   : > { %v2208_v9 = vpop.f32.mrb[4].mxu0 }
 0x155   : > { %v2209_v24 = vpop.f32.mrb[5].mxu0 }
 0x156   : > { %v2210_v41 = vadd.f32 %v2209_v24, %v2208_v9 }
 0x158   : > { %v999_v6 = vadd.f32 %v2210_v41, %v831_v35 }
 0x15d   : > { %v2243_v42 = vpop.f32.mrb[4].mxu1 }
 0x15e   : > { %v2244_v28 = vpop.f32.mrb[5].mxu1 }
 0x15f   : > { %v2245_v34 = vadd.f32 %v2244_v28, %v2243_v42 }
 0x161   : > { %v1103_v19 = vadd.f32 %v2245_v34, %v999_v6 }
 0x174   : > { %v2278_v7 = vpop.f32.mrb[6].mxu0 }
 0x175   : > { %v2279_v18 = vpop.f32.mrb[7].mxu0 }
 0x176   : > { %v2280_v46 = vadd.f32 %v2279_v18, %v2278_v7 }
 0x178   : > { %v1215_v63 = vadd.f32 %v2280_v46, %v1103_v19 }
 0x17d   : > { %v2313_v15 = vpop.f32.mrb[6].mxu1 }
 0x17e   : > { %v2314_v14 = vpop.f32.mrb[7].mxu1 }
 0x17f   : > { %v2315_v54 = vadd.f32 %v2314_v14, %v2313_v15 }
 0x181   : > { %v1447_v26 = vadd.f32 %v2315_v54, %v1215_v63 }
 0x194   : > { %v2348_v40 = vpop.f32.mrb[8].mxu0 }
 0x195   : > { %v2349_v21 = vpop.f32.mrb[9].mxu0 }
 0x196   : > { %v2350_v38 = vadd.f32 %v2349_v21, %v2348_v40 }
 0x198   : > { %v1585_v10 = vadd.f32 %v2350_v38, %v1447_v26 }
 0x19d   : > { %v2383_v52 = vpop.f32.mrb[8].mxu1 }
 0x19e   : > { %v2384_v17 = vpop.f32.mrb[9].mxu1 }
 0x19f   : > { %v2385_v47 = vadd.f32 %v2384_v17, %v2383_v52 }
 0x1a1   : > { %v1693_v45 = vadd.f32 %v2385_v47, %v1585_v10 }
 0x1b4   : > { %v2418_v61 = vpop.f32.mrb[10].mxu0 }
 0x1b5   : > { %v2419_v25 = vpop.f32.mrb[11].mxu0 }
 0x1b6   : > { %v2420_v27 = vadd.f32 %v2419_v25, %v2418_v61 }
 0x1b8   : > { %v1861_v37 = vadd.f32 %v2420_v27, %v1693_v45 }
 0x1bd   : > { %v2453_v59 = vpop.f32.mrb[10].mxu1 }
 0x1be   : > { %v2454_v36 = vpop.f32.mrb[11].mxu1 }
 0x1bf   : > { %v2455_v13 = vadd.f32 %v2454_v36, %v2453_v59 }
 0x1c1   : > { %v1965_v0 = vadd.f32 %v2455_v13, %v1861_v37 }
 0x1c3   : > { %v1968_v56 = vmax.f32 %v1965_v0, 0.0 }
 0x1c5   : > { %1970 = vst.msk [vmem:[%s168_s28] sm:$0xff] %vm1969_vm0, %v1968_v56 }
 0x1c6 PF: > { %s13_s12 = sadd.s32 1, %s2854_s12  }
 0x1c7   : > { %p10_p4 = scmp.ge.s32.totalorder %s13_s12, 4  }
 0x1c9   :  { %12 = sbr.rel (!%p10_p4) target bundleno = 1 (0x1), region = 62 }

</bundles_post_ra>
